<compile_context>
chip_gen: v7x
topology: tpu7x:2x2x1
jax: 0.10.0
libtpu: 0.0.40
codegen_flags: <defaults>
</compile_context>

<pallas_src>
import functools

import jax
import jax.numpy as jnp
from jax.experimental import pallas as pl
from jax.experimental.pallas import tpu as pltpu

_LANES = 128
_SUBLANES = 8


def _membrane_kernel(x_ref, o_ref, *, coefs):
    """Weighted sum over the (fully resident) time axis of the current block.

    x_ref : (T, rows, 128) block in VMEM
    o_ref : (rows, 128)    block in VMEM
    coefs : tuple of T static Python floats (0.8 ** (T-1-t))
    """
    # T is tiny and static -> unrolled VPU multiply-adds on dense (rows, 128)
    # slabs, accumulated in f32 regardless of input dtype.
    acc = jnp.float32(coefs[0]) * x_ref[0].astype(jnp.float32)
    for t in range(1, len(coefs)):
        acc = acc + jnp.float32(coefs[t]) * x_ref[t].astype(jnp.float32)
    o_ref[...] = acc.astype(o_ref.dtype)


@functools.partial(jax.jit, static_argnames=("block_rows",))
def membrane_output_layer(x, block_rows=2048):
    """x: (T, N, C, H, W) -> (N, C, H, W), matching the PyTorch forward."""
    T, N, C, H, W = x.shape
    M = N * C * H * W

    # Lane-dense layout: (T, rows_total, 128).  Only pad when M is not a
    # multiple of 128 (avoids materializing a padded HBM copy of x in the
    # common case where N*C*H*W is already lane-aligned).
    pad = (-M) % _LANES
    x2d = x.reshape(T, M)
    if pad:
        x2d = jnp.pad(x2d, ((0, 0), (0, pad)))
    Mp = M + pad
    rows_total = Mp // _LANES
    x3d = x2d.reshape(T, rows_total, _LANES)

    # Block sizing: full extent when small (block == full dim is always legal),
    # otherwise a large multiple-of-8 row slab.  A partial last block (when
    # rows_total % rows != 0) is masked by Pallas; the element mapping is 1:1
    # so correctness is unaffected.
    if rows_total <= block_rows:
        rows = rows_total
    else:
        rows = max((block_rows // _SUBLANES) * _SUBLANES, _SUBLANES)

    coefs = tuple(0.8 ** (T - 1 - t) for t in range(T))
    itemsize = jnp.dtype(x.dtype).itemsize

    # Scoped-VMEM budget derived from the double-buffered block working set
    # (input (T,rows,128) + output (rows,128), x2 buffers, x2 headroom),
    # clamped to fit every generation (v5e/v6e 128 MiB, v7x 64 MiB physical).
    block_bytes = (T + 1) * rows * _LANES * itemsize
    vmem_limit = int(min(max(4 * block_bytes, 16 * 1024 * 1024), 60 * 1024 * 1024))

    out2d = pl.pallas_call(
        functools.partial(_membrane_kernel, coefs=coefs),
        out_shape=jax.ShapeDtypeStruct((rows_total, _LANES), x.dtype),
        grid_spec=pltpu.PrefetchScalarGridSpec(
            num_scalar_prefetch=0,
            grid=(pl.cdiv(rows_total, rows),),
            in_specs=[
                # Full T on the leading axis, dense (rows, 128) slab per step.
                pl.BlockSpec((T, rows, _LANES), lambda i: (0, i, 0)),
            ],
            out_specs=pl.BlockSpec((rows, _LANES), lambda i: (i, 0)),
        ),
        compiler_params=pltpu.CompilerParams(
            # Single streaming axis; blocks are independent -> megacore shardable.
            dimension_semantics=("parallel",),
            vmem_limit_bytes=vmem_limit,
        ),
        cost_estimate=pl.CostEstimate(
            flops=2 * T * M,
            transcendentals=0,
            bytes_accessed=(T + 1) * M * itemsize,
        ),
    )(x3d)

    out_flat = out2d.reshape(-1)
    if pad:
        out_flat = out_flat[:M]
    return out_flat.reshape(N, C, H, W)


def _reference(x):
    T = x.shape[0]
    arr = jnp.arange(T - 1, -1, -1)
    coef = jnp.power(jnp.float32(0.8), arr.astype(jnp.float32))
    coef = coef.reshape(T, 1, 1, 1, 1).astype(x.dtype)
    return jnp.sum(x * coef, axis=0)


if __name__ == "__main__":
    key = jax.random.PRNGKey(0)
    T, N, C, H, W = 4, 2, 4, 16, 16   # timestep=4 as in the module default
    x = jax.random.normal(key, (T, N, C, H, W), dtype=jnp.float32)

    out = membrane_output_layer(x)
    out = jax.block_until_ready(out)

    ref = _reference(x)
    assert out.shape == (N, C, H, W), out.shape
    assert jnp.allclose(out, ref, atol=1e-5, rtol=1e-5), "mismatch vs reference"

    print("KERNEL_OK")
</pallas_src>

<mosaic_0001>
module attributes {stable_mosaic.version = 11 : i64} {
  func.func @_membrane_kernel(%arg0: i32, %arg1: memref<4x16x128xf32, #tpu.memory_space<vmem>>, %arg2: memref<16x128xf32, #tpu.memory_space<vmem>>) attributes {dimension_semantics = [#tpu.dimension_semantics<parallel>], iteration_bounds = array<i64: 1>, scalar_prefetch = 0 : i64, scratch_operands = 0 : i64, tpu.core_type = #tpu.core_type<tc>, window_params = [{transform_indices = @transform_0, window_bounds = array<i64: 4, 16, 128>}, {transform_indices = @transform_1, window_bounds = array<i64: 16, 128>}]} {
    %c0 = arith.constant 0 : index
    %c0_0 = arith.constant 0 : index
    %c0_1 = arith.constant 0 : index
    %0 = vector.load %arg1[%c0, %c0_0, %c0_1] : memref<4x16x128xf32, #tpu.memory_space<vmem>>, vector<1x16x128xf32>
    %1 = vector.shape_cast %0 : vector<1x16x128xf32> to vector<16x128xf32>
    %cst = arith.constant 5.120000e-01 : f32
    %2 = vector.broadcast %cst : f32 to vector<16x128xf32>
    %3 = arith.mulf %2, %1 : vector<16x128xf32>
    %c1 = arith.constant 1 : index
    %c0_2 = arith.constant 0 : index
    %c0_3 = arith.constant 0 : index
    %4 = vector.load %arg1[%c1, %c0_2, %c0_3] : memref<4x16x128xf32, #tpu.memory_space<vmem>>, vector<1x16x128xf32>
    %5 = vector.shape_cast %4 : vector<1x16x128xf32> to vector<16x128xf32>
    %cst_4 = arith.constant 6.400000e-01 : f32
    %6 = vector.broadcast %cst_4 : f32 to vector<16x128xf32>
    %7 = arith.mulf %6, %5 : vector<16x128xf32>
    %8 = arith.addf %3, %7 : vector<16x128xf32>
    %c2 = arith.constant 2 : index
    %c0_5 = arith.constant 0 : index
    %c0_6 = arith.constant 0 : index
    %9 = vector.load %arg1[%c2, %c0_5, %c0_6] : memref<4x16x128xf32, #tpu.memory_space<vmem>>, vector<1x16x128xf32>
    %10 = vector.shape_cast %9 : vector<1x16x128xf32> to vector<16x128xf32>
    %cst_7 = arith.constant 8.000000e-01 : f32
    %11 = vector.broadcast %cst_7 : f32 to vector<16x128xf32>
    %12 = arith.mulf %11, %10 : vector<16x128xf32>
    %13 = arith.addf %8, %12 : vector<16x128xf32>
    %c3 = arith.constant 3 : index
    %c0_8 = arith.constant 0 : index
    %c0_9 = arith.constant 0 : index
    %14 = vector.load %arg1[%c3, %c0_8, %c0_9] : memref<4x16x128xf32, #tpu.memory_space<vmem>>, vector<1x16x128xf32>
    %15 = vector.shape_cast %14 : vector<1x16x128xf32> to vector<16x128xf32>
    %cst_10 = arith.constant 1.000000e+00 : f32
    %16 = vector.broadcast %cst_10 : f32 to vector<16x128xf32>
    %17 = arith.mulf %16, %15 : vector<16x128xf32>
    %18 = arith.addf %13, %17 : vector<16x128xf32>
    %c0_11 = arith.constant 0 : index
    %c0_12 = arith.constant 0 : index
    %19 = vector.load %arg2[%c0_11, %c0_12] : memref<16x128xf32, #tpu.memory_space<vmem>>, vector<16x128xf32>
    tpu.vector_store %arg2[%c0_11, %c0_12], %18 {strides = array<i32>} : memref<16x128xf32, #tpu.memory_space<vmem>>, vector<16x128xf32>,
    return
  }
  func.func @transform_0(%arg0: i32) -> (i32, i32, i32) {
    %c0_i32 = arith.constant 0 : i32
    %c0_i32_0 = arith.constant 0 : i32
    %c0_i32_1 = arith.constant 0 : i32
    return %c0_i32, %arg0, %c0_i32_0 : i32, i32, i32
  }
  func.func @transform_1(%arg0: i32) -> (i32, i32) {
    %c0_i32 = arith.constant 0 : i32
    %c0_i32_0 = arith.constant 0 : i32
    return %arg0, %c0_i32 : i32, i32
  }
}

</mosaic_0001>

<bundles_post_ra>
// kernel: membrane_output_layer.1
= control target key start
LH: loop header
LB: loop body
LE: loop exit
PB: predicated region body
PF: predicated region fallthrough
CT: control target
= control target key end

     0   :  { %s83_s0 = inlined_call_operand.vmem [shape: f32[4,16,128], index: 0, kind: input, shape index: {}]   ;;  %s84_s1 = inlined_call_operand.vmem [shape: f32[16,128], index: 1, kind: output, shape index: {}]  }
   0x1   :  { %v8_v0 = vld [vmem:[%s83_s0] sm:$0xff]  ;;  %v37_v1 = vld [vmem:[%s83_s0 + $0x10] sm:$0xff]  ;;  %v9_v6 = vld [vmem:[%s83_s0 + $0x8] sm:$0xff] }
   0x2   :  { %v39_v2 = vld [vmem:[%s83_s0 + $0x20] sm:$0xff]  ;;  %v10_v3 = vmul.f32 0.512, %v8_v0  ;;  %v15_v4 = vmul.f32 0.64, %v37_v1  ;;  %v38_v7 = vld [vmem:[%s83_s0 + $0x18] sm:$0xff] }
   0x3   :  { %v22_v5 = vmul.f32 0.8, %v39_v2  ;;  %v11_v9 = vmul.f32 0.512, %v9_v6  ;;  %v16_v10 = vmul.f32 0.64, %v38_v7 }
   0x4   :  { %v17_v8 = vadd.f32 %v15_v4, %v10_v3  ;;  %v40_v11 = vld [vmem:[%s83_s0 + $0x28] sm:$0xff]  ;;  %v41_v12 = vld [vmem:[%s83_s0 + $0x30] sm:$0xff]  ;;  %v42_v16 = vld [vmem:[%s83_s0 + $0x38] sm:$0xff] }
   0x5   :  { %v23_v13 = vmul.f32 0.8, %v40_v11  ;;  %v18_v15 = vadd.f32 %v16_v10, %v11_v9 }
   0x6   :  { %v24_v14 = vadd.f32 %v22_v5, %v17_v8 }
   0x7   :  { %v25_v18 = vadd.f32 %v23_v13, %v18_v15 }
   0x8   :  { %v29_v17 = vadd.f32 %v41_v12, %v24_v14 }
   0x9   :  { %v30_v19 = vadd.f32 %v42_v16, %v25_v18 }
   0xa   :  { %31 = vst [vmem:[%s84_s1] sm:$0xff] %v29_v17 }
   0xb   :  { %32 = vst [vmem:[%s84_s1 + $0x8] sm:$0xff] %v30_v19 }

</bundles_post_ra>
